<compile_context>
chip_gen: v5e
topology: v5e:2x2
jax: 0.10.0
libtpu: 0.0.40
codegen_flags: <defaults>
</compile_context>

<pallas_src>
import math

import jax
import jax.numpy as jnp
from jax.experimental import pallas as pl
from jax.experimental.pallas import tpu as pltpu

_LANE = 128
_MiB = 1024 * 1024


def _add_kernel(a_ref, b_ref, o_ref):
    # Pure per-vreg VPU add on 2-D lane-dense tiles; no broadcasts, no XLU work.
    o_ref[...] = (a_ref[...] + b_ref[...]).astype(o_ref.dtype)


def _sublane_align(itemsize: int) -> int:
    # f32 -> 8, bf16 -> 16, int8/fp8 -> 32 (sub-32-bit dtypes pack along sublanes).
    return max(8, 32 // max(1, itemsize))


def _vmem_capacity_bytes() -> int:
    try:
        cap = int(getattr(pltpu.get_tpu_info(), "vmem_capacity_bytes", 0))
        if cap > 0:
            return cap
    except Exception:
        pass
    return 64 * _MiB  # conservative default (v7x per-TC VMEM)


def _per_buffer_budget_bytes() -> int:
    # 3 arrays x 2 pipeline buffers = 6 live VMEM buffers; cap them at ~3/8 of
    # VMEM (v7x: ~4 MiB/buffer, v5e/v6e: ~8 MiB/buffer) so the ~0.35us
    # per-grid-step overhead is a few % of the DMA time on every generation
    # while leaving headroom for compiler scratch.
    return max(2 * _MiB, _vmem_capacity_bytes() // 16)


def _balanced_tile(rows: int, target: int, align: int) -> int:
    if rows <= align or target >= rows:
        return rows
    nsteps = pl.cdiv(rows, max(target, align))
    tile = pl.cdiv(rows, nsteps)
    tile += (-tile) % align        # sublane-aligned
    return min(max(tile, align), rows)


def _row_tile(rows: int, itemsize: int) -> int:
    align = _sublane_align(itemsize)
    target = max(align, _per_buffer_budget_bytes() // (_LANE * itemsize))
    return _balanced_tile(rows, target, align)


def _dimension_semantics(num_steps: int):
    # "parallel" vs "arbitrary" does not change codegen; only CORE_PARALLEL
    # actually splits grid steps across v7x's two TensorCores. Use it only when
    # the device clearly has multiple TensorCores and there is enough work.
    try:
        kind = jax.devices()[0].device_kind.lower()
    except Exception:
        kind = ""
    if ("v7" in kind or "7x" in kind) and num_steps >= 2:
        return (pltpu.CORE_PARALLEL,)
    return ("parallel",)


def _tiled_add(a2: jax.Array, b2: jax.Array, out_dtype, tile_rows: int) -> jax.Array:
    """Row-tiled element-wise add of two 2-D arrays of identical shape."""
    rows, cols = a2.shape
    itemsize = jnp.dtype(out_dtype).itemsize
    align = _sublane_align(itemsize)
    num_steps = pl.cdiv(rows, tile_rows)
    blk = (tile_rows, cols)

    def idx(i):
        return (i, 0)

    # VMEM footprint of one buffer (lane dim pads to 128, sublane dim to align).
    padded_cols = cols + (-cols) % _LANE
    padded_tile = tile_rows + (-tile_rows) % align
    buf_bytes = padded_tile * padded_cols * itemsize
    vmem_limit = max(16 * _MiB, 6 * buf_bytes + 8 * _MiB)
    vmem_limit = min(int(vmem_limit), _vmem_capacity_bytes())

    total = rows * cols
    cost = pl.CostEstimate(flops=total, transcendentals=0,
                           bytes_accessed=3 * total * itemsize)

    kwargs = {}
    if a2.dtype == jnp.dtype(out_dtype):
        # Output overwrites x_resid in place (dead after the add); under jit this
        # removes the extra N-sized HBM output allocation/copy for free.
        kwargs["input_output_aliases"] = {0: 0}

    return pl.pallas_call(
        _add_kernel,
        out_shape=jax.ShapeDtypeStruct((rows, cols), out_dtype),
        grid_spec=pltpu.PrefetchScalarGridSpec(
            num_scalar_prefetch=0,
            grid=(num_steps,),
            in_specs=[pl.BlockSpec(blk, idx), pl.BlockSpec(blk, idx)],
            out_specs=pl.BlockSpec(blk, idx),
        ),
        compiler_params=pltpu.CompilerParams(
            dimension_semantics=_dimension_semantics(num_steps),
            vmem_limit_bytes=vmem_limit,
        ),
        cost_estimate=cost,
        **kwargs,
    )(a2, b2)


def residual_add(x_resid: jax.Array, x: jax.Array) -> jax.Array:
    """Element-wise residual add (x_resid + x) via a Pallas TPU kernel."""
    assert x_resid.shape == x.shape, (x_resid.shape, x.shape)
    shape = x.shape
    total = math.prod(shape) if shape else 1
    out_dtype = jnp.result_type(x_resid.dtype, x.dtype)
    itemsize = jnp.dtype(out_dtype).itemsize

    if total == 0:
        return jnp.zeros(shape, out_dtype)

    # TODO(synk): structurally the biggest win is fusing this add into the
    # epilogue of the producing kernel (fn's final matmul) or letting XLA fuse a
    # plain `x_resid + x`; a standalone kernel can never avoid the extra
    # read(x_resid)+read(x)+write(out) HBM pass.

    if total % _LANE == 0 and total >= _LANE:
        # Lane-dense path: fold everything into (rows, 128) so every store is a
        # full, unmasked vreg; tile the row axis and let BlockSpec pipeline.
        rows = total // _LANE
        a2 = x_resid.reshape(rows, _LANE)
        b2 = x.reshape(rows, _LANE)
        tile = _row_tile(rows, itemsize)
        return _tiled_add(a2, b2, out_dtype, tile).reshape(shape)

    # total not a multiple of 128: keep the true last dim as a full-extent block
    # dim and tile only the leading axis (never a single whole-array block).
    last = shape[-1] if len(shape) >= 1 else 1
    lead = total // last
    align = _sublane_align(itemsize)
    padded_last = last + (-last) % _LANE
    budget = _per_buffer_budget_bytes()

    if lead >= align and align * padded_last * itemsize <= budget:
        a2 = x_resid.reshape(lead, last)
        b2 = x.reshape(lead, last)
        target = max(align, budget // max(padded_last * itemsize, 1))
        tile = _balanced_tile(lead, target, align)
        return _tiled_add(a2, b2, out_dtype, tile).reshape(shape)

    # Degenerate odd shapes (tiny arrays, or an enormous non-128-multiple last
    # dim): pad the flattened array to a lane multiple and reuse the lane-dense
    # path, slicing the padding back off afterwards.
    pad = (-total) % _LANE
    a1 = jnp.pad(x_resid.reshape(total), (0, pad))
    b1 = jnp.pad(x.reshape(total), (0, pad))
    rows = (total + pad) // _LANE
    a2 = a1.reshape(rows, _LANE)
    b2 = b1.reshape(rows, _LANE)
    tile = _row_tile(rows, itemsize)
    out = _tiled_add(a2, b2, out_dtype, tile)
    return out.reshape(rows * _LANE)[:total].reshape(shape)


class Residual:
    """Residual layer: output of `fn` added back to its input (Pallas add hot path)."""

    def __init__(self, fn):
        self.fn = fn

    def __call__(self, x_data):
        if isinstance(x_data, dict):
            x_resid = self.fn(x_data)['x_b']
            return {'x_a': x_data['x_a'],
                    'x_b': residual_add(x_resid, x_data['x_b'])}
        else:
            x, mask_info = x_data
            x_resid, _ = self.fn(x_data)
            return (residual_add(x_resid, x), mask_info)


if __name__ == "__main__":
    B, S, D = 2, 8, 32  # batch, seq, hidden
    key = jax.random.PRNGKey(0)
    kx, ka, kb, kw = jax.random.split(key, 4)

    w = jax.random.normal(kw, (D, D), dtype=jnp.float32) * 0.1

    # TODO(synk): the wrapped `fn` is an arbitrary sub-module; only the residual
    # add runs as a Pallas kernel. A simple JAX callable stands in for it here.

    # ---- tuple branch: x_data = (x, mask_info) --------------------------------
    x = jax.random.normal(kx, (B, S, D), dtype=jnp.float32)
    mask_info = jnp.ones((B, S), dtype=jnp.int32)

    def fn_tuple(x_data):
        xin, m = x_data
        return jnp.tanh(xin @ w), m

    res = Residual(fn_tuple)
    out_x, out_mask = res((x, mask_info))
    out_x = jax.block_until_ready(out_x)

    ref_x = jnp.tanh(x @ w) + x
    assert out_x.shape == (B, S, D)
    assert jnp.allclose(out_x, ref_x, atol=1e-5, rtol=1e-5), "tuple branch mismatch"
    assert bool((out_mask == mask_info).all()), "mask_info must pass through untouched"

    # ---- dict branch: x_data = {'x_a': ..., 'x_b': ...} ------------------------
    x_a = jax.random.normal(ka, (B, S, D), dtype=jnp.float32)
    x_b = jax.random.normal(kb, (B, S, D), dtype=jnp.float32)

    def fn_dict(d):
        return {'x_a': d['x_a'], 'x_b': jnp.tanh(d['x_b'] @ w)}

    res_d = Residual(fn_dict)
    out_d = res_d({'x_a': x_a, 'x_b': x_b})
    out_b = jax.block_until_ready(out_d['x_b'])

    ref_b = jnp.tanh(x_b @ w) + x_b
    assert jnp.allclose(out_b, ref_b, atol=1e-5, rtol=1e-5), "dict branch mismatch"
    assert jnp.allclose(out_d['x_a'], x_a), "'x_a' must pass through untouched"

    # ---- fallback paths (total not a multiple of 128) ---------------------------
    kc, kd = jax.random.split(kb)
    a_odd = jax.random.normal(kc, (2, 8, 20), dtype=jnp.float32)   # lead-tiled fallback
    b_odd = jax.random.normal(kd, (2, 8, 20), dtype=jnp.float32)
    out_odd = jax.block_until_ready(residual_add(a_odd, b_odd))
    assert jnp.allclose(out_odd, a_odd + b_odd, atol=1e-6, rtol=1e-6), "odd-shape mismatch"

    a_tiny = jnp.arange(5, dtype=jnp.float32)                      # pad + lane-dense fallback
    b_tiny = jnp.ones((5,), dtype=jnp.float32)
    out_tiny = jax.block_until_ready(residual_add(a_tiny, b_tiny))
    assert jnp.allclose(out_tiny, a_tiny + b_tiny), "tiny-shape mismatch"

    print("KERNEL_OK")
</pallas_src>

<mosaic_0001>
module attributes {stable_mosaic.version = 11 : i64} {
  func.func @_add_kernel(%arg0: i32, %arg1: memref<4x128xf32, #tpu.memory_space<vmem>>, %arg2: memref<4x128xf32, #tpu.memory_space<vmem>>, %arg3: memref<4x128xf32, #tpu.memory_space<vmem>>) attributes {dimension_semantics = [#tpu.dimension_semantics<parallel>], iteration_bounds = array<i64: 1>, scalar_prefetch = 0 : i64, scratch_operands = 0 : i64, tpu.core_type = #tpu.core_type<tc>, window_params = [{transform_indices = @transform_0, window_bounds = array<i64: 4, 128>}, {transform_indices = @transform_1, window_bounds = array<i64: 4, 128>}, {transform_indices = @transform_2, window_bounds = array<i64: 4, 128>}]} {
    %c0 = arith.constant 0 : index
    %c0_0 = arith.constant 0 : index
    %0 = vector.load %arg1[%c0, %c0_0] : memref<4x128xf32, #tpu.memory_space<vmem>>, vector<4x128xf32>
    %c0_1 = arith.constant 0 : index
    %c0_2 = arith.constant 0 : index
    %1 = vector.load %arg2[%c0_1, %c0_2] : memref<4x128xf32, #tpu.memory_space<vmem>>, vector<4x128xf32>
    %2 = arith.addf %0, %1 : vector<4x128xf32>
    %c0_3 = arith.constant 0 : index
    %c0_4 = arith.constant 0 : index
    %3 = vector.load %arg3[%c0_3, %c0_4] : memref<4x128xf32, #tpu.memory_space<vmem>>, vector<4x128xf32>
    tpu.vector_store %arg3[%c0_3, %c0_4], %2 {strides = array<i32>} : memref<4x128xf32, #tpu.memory_space<vmem>>, vector<4x128xf32>,
    return
  }
  func.func @transform_0(%arg0: i32) -> (i32, i32) {
    %c0_i32 = arith.constant 0 : i32
    %c0_i32_0 = arith.constant 0 : i32
    return %arg0, %c0_i32 : i32, i32
  }
  func.func @transform_1(%arg0: i32) -> (i32, i32) {
    %c0_i32 = arith.constant 0 : i32
    %c0_i32_0 = arith.constant 0 : i32
    return %arg0, %c0_i32 : i32, i32
  }
  func.func @transform_2(%arg0: i32) -> (i32, i32) {
    %c0_i32 = arith.constant 0 : i32
    %c0_i32_0 = arith.constant 0 : i32
    return %arg0, %c0_i32 : i32, i32
  }
}

</mosaic_0001>

<bundles_post_ra>
// kernel: tpu_custom_call.1
= control target key start
LH: loop header
LB: loop body
LE: loop exit
PB: predicated region body
PF: predicated region fallthrough
CT: control target
= control target key end

     0   :  { %7 = vsyncpa [#allocation3], 0  ;;  %s127_s0 = inlined_call_operand.hbm [shape: f32[4,128], index: 0, kind: input, shape index: {}, may-alias: {0,2}]   ;;  %s128_s1 = inlined_call_operand.vmem [shape: f32[4,128], index: 1, kind: input, shape index: {}]   ;;  %s129_s2 = inlined_call_operand.hbm [shape: f32[4,128], index: 2, kind: output, shape index: {}, may-alias: {0,2}]  }
   0x1   :  { %8 = vsyncpa [#allocation4], 0  ;;  %s14_s11 = sshll.u32 %s127_s0, 4  ;;  %s101_s12 = smov [#allocation2]   ;;  %s15_s11 = int_to_ptr.hbm [resolvable:$true] %s14_s11 }
   0x2   :  { %s16_s13 = sshll.u32 %s101_s12, 4  ;;  %s17_s13 = int_to_ptr.vmem [resolvable:$true] %s16_s13 }
   0x3   :  { %19 = dma.hbm_to_vmem [thread:$0]  %s15_s11, 64, %s17_s13, [#allocation3]  }
   0x4   :  { %97 = dma.done.wait [#allocation3], 64  }
   0x5   :  { %98 = vsyncadd [#allocation3], 4294967232  ;;  %s102_s14 = smov [#allocation5]   ;;  %s37_s18 = sshll.u32 %s129_s2, 4  ;;  %v26_v0 = vld [vmem:[#allocation2] sm:$0xf]  ;;  %s38_s18 = int_to_ptr.hbm [resolvable:$true] %s37_s18 }
   0x6   :  { %s35_s15 = sshll.u32 %s102_s14, 4  ;;  %v27_v1 = vld [vmem:[%s128_s1] sm:$0xf]  ;;  %s36_s15 = int_to_ptr.vmem [resolvable:$true] %s35_s15 }
   0x7   :  { %v28_v2 = vadd.f32 %v27_v1, %v26_v0 }
   0x9   :  { %29 = vst [vmem:[#allocation5] sm:$0xf] %v28_v2 }
   0xa   :  { %40 = dma.vmem_to_hbm [thread:$0]  %s36_s15, 64, %s38_s18, [#allocation4]  }
   0xb   :  { %99 = dma.done.wait [#allocation4], 64  }
   0xc   :  { %100 = vsyncadd [#allocation4], 4294967232 }
   0xd   :  { %45 = vsyncpa [#allocation3], 1 }
   0xe   :  { %46 = vsyncpa [#allocation4], 1 }

</bundles_post_ra>
